<compile_context>
chip_gen: v6e
topology: v6e:2x2x1
jax: 0.10.0
libtpu: 0.0.40
codegen_flags: <defaults>
</compile_context>

<pallas_src>
import jax
import jax.numpy as jnp
from jax.experimental import pallas as pl
from jax.experimental.pallas import tpu as pltpu

_BN_EPS = 1e-5


# ---------------------------------------------------------------------------
# Pass 1: first Linear + per-tile BatchNorm partial statistics
# ---------------------------------------------------------------------------
def _layer1_kernel(x_ref, w1_ref, b1_ref, h_ref, psum_ref, psumsq_ref):
    # bf16 inputs to the MXU, f32 accumulation; bias add in f32.
    x = x_ref[...].astype(jnp.bfloat16)
    h = jnp.dot(x, w1_ref[...], preferred_element_type=jnp.float32) + b1_ref[...]
    h_ref[...] = h
    # One-pass stats: per-column partial sum and sum-of-squares for this tile
    # (reduced to full-batch mean/var in the wrapper, so tiling over the batch
    #  does NOT change BatchNorm semantics).
    psum_ref[...] = jnp.sum(h, axis=0, keepdims=True)[None]
    psumsq_ref[...] = jnp.sum(h * h, axis=0, keepdims=True)[None]


# ---------------------------------------------------------------------------
# Pass 2: fused BN affine + ReLU + second Linear
# ---------------------------------------------------------------------------
def _layer2_kernel(h_ref, scale_ref, shift_ref, w2_ref, b2_ref, o_ref):
    # Fused BN: 1 mul + 1 add per element (scale/shift precomputed per column).
    h = h_ref[...] * scale_ref[...] + shift_ref[...]
    h = jnp.maximum(h, 0.0)
    out = jnp.dot(h.astype(jnp.bfloat16), w2_ref[...],
                  preferred_element_type=jnp.float32) + b2_ref[...]
    o_ref[...] = out.astype(o_ref.dtype)


def _pick_batch_tile(n):
    """Largest convenient batch tile that divides n (keeps BN stats exact)."""
    for tm in (512, 256, 128):
        if n % tm == 0:
            return tm
    # TODO(synk): mask ragged batch tails instead of falling back to one tile.
    return n


def prediction_mlp(x, w1, b1, gamma, beta, w2, b2):
    """x: (N, in_dim); w1: (in_dim, hidden); w2: (hidden, out_dim); vectors (1, dim)."""
    n, in_dim = x.shape
    hidden = w1.shape[1]
    out_dim = w2.shape[1]
    tm = _pick_batch_tile(n)
    n_tiles = n // tm

    # Pre-cast weights to bf16 once (MXU-native); biases stay f32.
    w1_bf16 = w1.astype(jnp.bfloat16)
    w2_bf16 = w2.astype(jnp.bfloat16)
    b1_f32 = b1.astype(jnp.float32)
    b2_f32 = b2.astype(jnp.float32)

    # ---- pass 1: tiled x @ w1 + b1, plus per-tile BN partial statistics ----
    h, psum, psumsq = pl.pallas_call(
        _layer1_kernel,
        out_shape=(
            jax.ShapeDtypeStruct((n, hidden), jnp.float32),
            jax.ShapeDtypeStruct((n_tiles, 1, hidden), jnp.float32),
            jax.ShapeDtypeStruct((n_tiles, 1, hidden), jnp.float32),
        ),
        grid=(n_tiles,),
        in_specs=[
            pl.BlockSpec((tm, in_dim), lambda i: (i, 0)),        # x: batch-tiled
            pl.BlockSpec((in_dim, hidden), lambda i: (0, 0)),    # w1: resident
            pl.BlockSpec((1, hidden), lambda i: (0, 0)),         # b1: resident
        ],
        out_specs=(
            pl.BlockSpec((tm, hidden), lambda i: (i, 0)),        # h: batch-tiled
            pl.BlockSpec((1, 1, hidden), lambda i: (i, 0, 0)),   # partial sum
            pl.BlockSpec((1, 1, hidden), lambda i: (i, 0, 0)),   # partial sumsq
        ),
        compiler_params=pltpu.CompilerParams(
            dimension_semantics=("parallel",)),
    )(x, w1_bf16, b1_f32)

    # ---- full-batch BN statistics + fused affine (tiny O(hidden) glue) ----
    mean = jnp.sum(psum[:, 0, :], axis=0, keepdims=True) / n
    var = jnp.sum(psumsq[:, 0, :], axis=0, keepdims=True) / n - mean * mean  # biased
    var = jnp.maximum(var, 0.0)
    scale = gamma.astype(jnp.float32) * jax.lax.rsqrt(var + _BN_EPS)
    shift = beta.astype(jnp.float32) - mean * scale

    # ---- pass 2: fused BN affine + ReLU + second Linear, tiled over batch ----
    out = pl.pallas_call(
        _layer2_kernel,
        out_shape=jax.ShapeDtypeStruct((n, out_dim), x.dtype),
        grid=(n_tiles,),
        in_specs=[
            pl.BlockSpec((tm, hidden), lambda i: (i, 0)),        # h: batch-tiled
            pl.BlockSpec((1, hidden), lambda i: (0, 0)),         # scale: resident
            pl.BlockSpec((1, hidden), lambda i: (0, 0)),         # shift: resident
            pl.BlockSpec((hidden, out_dim), lambda i: (0, 0)),   # w2: resident
            pl.BlockSpec((1, out_dim), lambda i: (0, 0)),        # b2: resident
        ],
        out_specs=pl.BlockSpec((tm, out_dim), lambda i: (i, 0)),
        compiler_params=pltpu.CompilerParams(
            dimension_semantics=("parallel",)),
    )(h, scale, shift, w2_bf16, b2_f32)
    return out


def init_params(key, in_dim, hidden_dim, out_dim):
    """Deterministic synthetic init (shapes match PredictionMLP.__init__)."""
    k1, k2, k3, k4 = jax.random.split(key, 4)
    bound1 = 1.0 / jnp.sqrt(in_dim)
    w1 = jax.random.uniform(k1, (in_dim, hidden_dim), jnp.float32, -bound1, bound1)
    b1 = jax.random.uniform(k2, (1, hidden_dim), jnp.float32, -bound1, bound1)
    gamma = jnp.ones((1, hidden_dim), jnp.float32)   # BatchNorm1d weight
    beta = jnp.zeros((1, hidden_dim), jnp.float32)   # BatchNorm1d bias
    bound2 = 1.0 / jnp.sqrt(hidden_dim)
    w2 = jax.random.uniform(k3, (hidden_dim, out_dim), jnp.float32, -bound2, bound2)
    b2 = jax.random.uniform(k4, (1, out_dim), jnp.float32, -bound2, bound2)
    return w1, b1, gamma, beta, w2, b2


def reference(x, w1, b1, gamma, beta, w2, b2):
    """Pure-JAX f32 reference (PyTorch training-mode BatchNorm1d, biased var)."""
    h = x @ w1 + b1
    mean = h.mean(axis=0, keepdims=True)
    var = ((h - mean) ** 2).mean(axis=0, keepdims=True)
    h = (h - mean) / jnp.sqrt(var + _BN_EPS)
    h = h * gamma + beta
    h = jnp.maximum(h, 0.0)
    return h @ w2 + b2


if __name__ == "__main__":
    # Small shapes consistent with the bottleneck structure (in_dim == out_dim,
    # hidden smaller). SimSiam-scale would be (4096, 2048, 512, 2048).
    batch, in_dim, hidden_dim, out_dim = 8, 256, 128, 256

    key = jax.random.PRNGKey(0)
    kx, kp = jax.random.split(key)
    x = jax.random.normal(kx, (batch, in_dim), jnp.float32)
    params = init_params(kp, in_dim, hidden_dim, out_dim)

    out = jax.block_until_ready(prediction_mlp(x, *params))
    ref = reference(x, *params)

    assert out.shape == (batch, out_dim)
    # Kernel uses bf16 MXU operands with f32 accumulation, so compare against
    # the f32 reference with a bf16-appropriate tolerance.
    assert jnp.allclose(out, ref, atol=2e-2, rtol=2e-2), "mismatch vs reference"

    print("KERNEL_OK")
</pallas_src>

<mosaic_0001>
module attributes {stable_mosaic.version = 11 : i64} {
  func.func @_layer1_kernel(%arg0: i32, %arg1: memref<8x256xf32, #tpu.memory_space<vmem>>, %arg2: memref<256x128xbf16, #tpu.memory_space<vmem>>, %arg3: memref<1x128xf32, #tpu.memory_space<vmem>>, %arg4: memref<8x128xf32, #tpu.memory_space<vmem>>, %arg5: memref<1x1x128xf32, #tpu.memory_space<vmem>>, %arg6: memref<1x1x128xf32, #tpu.memory_space<vmem>>) attributes {dimension_semantics = [#tpu.dimension_semantics<parallel>], iteration_bounds = array<i64: 1>, scalar_prefetch = 0 : i64, scratch_operands = 0 : i64, tpu.core_type = #tpu.core_type<tc>, window_params = [{transform_indices = @transform_0, window_bounds = array<i64: 8, 256>}, {pipeline_mode = #tpu.pipeline_mode<synchronous>, transform_indices = @transform_1, window_bounds = array<i64: 256, 128>}, {pipeline_mode = #tpu.pipeline_mode<synchronous>, transform_indices = @transform_2, window_bounds = array<i64: 1, 128>}, {transform_indices = @transform_3, window_bounds = array<i64: 8, 128>}, {transform_indices = @transform_4, window_bounds = array<i64: 1, 1, 128>}, {transform_indices = @transform_5, window_bounds = array<i64: 1, 1, 128>}]} {
    %c0 = arith.constant 0 : index
    %c0_0 = arith.constant 0 : index
    %0 = vector.load %arg1[%c0, %c0_0] : memref<8x256xf32, #tpu.memory_space<vmem>>, vector<8x256xf32>
    %1 = arith.truncf %0 : vector<8x256xf32> to vector<8x256xbf16>
    %c0_1 = arith.constant 0 : index
    %c0_2 = arith.constant 0 : index
    %2 = vector.load %arg2[%c0_1, %c0_2] : memref<256x128xbf16, #tpu.memory_space<vmem>>, vector<256x128xbf16>
    %cst = arith.constant dense<0.000000e+00> : vector<8x128xf32>
    %3 = tpu.matmul %1, %2, %cst {dimension_numbers = #tpu.dot_dimension_numbers<[1], [0], [0], [1], [0, 0, 1, 1], [], []>} : vector<8x256xbf16>, vector<256x128xbf16>, vector<8x128xf32> -> vector<8x128xf32>
    %c0_3 = arith.constant 0 : index
    %c0_4 = arith.constant 0 : index
    %4 = vector.load %arg3[%c0_3, %c0_4] : memref<1x128xf32, #tpu.memory_space<vmem>>, vector<1x128xf32>
    %5 = vector.broadcast %4 : vector<1x128xf32> to vector<8x128xf32>
    %6 = arith.addf %3, %5 : vector<8x128xf32>
    %c0_5 = arith.constant 0 : index
    %c0_6 = arith.constant 0 : index
    %7 = vector.load %arg4[%c0_5, %c0_6] : memref<8x128xf32, #tpu.memory_space<vmem>>, vector<8x128xf32>
    tpu.vector_store %arg4[%c0_5, %c0_6], %6 {strides = array<i32>} : memref<8x128xf32, #tpu.memory_space<vmem>>, vector<8x128xf32>,
    %cst_7 = arith.constant dense<0.000000e+00> : vector<128xf32>
    %8 = vector.multi_reduction <add>, %6, %cst_7 [0] : vector<8x128xf32> to vector<128xf32>
    %9 = vector.shape_cast %8 : vector<128xf32> to vector<1x128xf32>
    %10 = vector.shape_cast %9 : vector<1x128xf32> to vector<1x1x128xf32>
    %c0_8 = arith.constant 0 : index
    %c0_9 = arith.constant 0 : index
    %c0_10 = arith.constant 0 : index
    %11 = vector.load %arg5[%c0_8, %c0_9, %c0_10] : memref<1x1x128xf32, #tpu.memory_space<vmem>>, vector<1x1x128xf32>
    tpu.vector_store %arg5[%c0_8, %c0_9, %c0_10], %10 {strides = array<i32>} : memref<1x1x128xf32, #tpu.memory_space<vmem>>, vector<1x1x128xf32>,
    %12 = arith.mulf %6, %6 : vector<8x128xf32>
    %cst_11 = arith.constant dense<0.000000e+00> : vector<128xf32>
    %13 = vector.multi_reduction <add>, %12, %cst_11 [0] : vector<8x128xf32> to vector<128xf32>
    %14 = vector.shape_cast %13 : vector<128xf32> to vector<1x128xf32>
    %15 = vector.shape_cast %14 : vector<1x128xf32> to vector<1x1x128xf32>
    %c0_12 = arith.constant 0 : index
    %c0_13 = arith.constant 0 : index
    %c0_14 = arith.constant 0 : index
    %16 = vector.load %arg6[%c0_12, %c0_13, %c0_14] : memref<1x1x128xf32, #tpu.memory_space<vmem>>, vector<1x1x128xf32>
    tpu.vector_store %arg6[%c0_12, %c0_13, %c0_14], %15 {strides = array<i32>} : memref<1x1x128xf32, #tpu.memory_space<vmem>>, vector<1x1x128xf32>,
    return
  }
  func.func @transform_0(%arg0: i32) -> (i32, i32) {
    %c0_i32 = arith.constant 0 : i32
    %c0_i32_0 = arith.constant 0 : i32
    return %arg0, %c0_i32 : i32, i32
  }
  func.func @transform_1(%arg0: i32) -> (i32, i32) {
    %c0_i32 = arith.constant 0 : i32
    %c0_i32_0 = arith.constant 0 : i32
    %c0_i32_1 = arith.constant 0 : i32
    return %c0_i32, %c0_i32_0 : i32, i32
  }
  func.func @transform_2(%arg0: i32) -> (i32, i32) {
    %c0_i32 = arith.constant 0 : i32
    %c0_i32_0 = arith.constant 0 : i32
    %c0_i32_1 = arith.constant 0 : i32
    return %c0_i32, %c0_i32_0 : i32, i32
  }
  func.func @transform_3(%arg0: i32) -> (i32, i32) {
    %c0_i32 = arith.constant 0 : i32
    %c0_i32_0 = arith.constant 0 : i32
    return %arg0, %c0_i32 : i32, i32
  }
  func.func @transform_4(%arg0: i32) -> (i32, i32, i32) {
    %c0_i32 = arith.constant 0 : i32
    %c0_i32_0 = arith.constant 0 : i32
    %c0_i32_1 = arith.constant 0 : i32
    return %arg0, %c0_i32, %c0_i32_0 : i32, i32, i32
  }
  func.func @transform_5(%arg0: i32) -> (i32, i32, i32) {
    %c0_i32 = arith.constant 0 : i32
    %c0_i32_0 = arith.constant 0 : i32
    %c0_i32_1 = arith.constant 0 : i32
    return %arg0, %c0_i32, %c0_i32_0 : i32, i32, i32
  }
}

</mosaic_0001>

<bundles_post_ra>
// kernel: tpu_custom_call.1
= control target key start
LH: loop header
LB: loop body
LE: loop exit
PB: predicated region body
PF: predicated region fallthrough
CT: control target
= control target key end

     0   :  { %11 = vsyncpa [#allocation3], 0  ;;  %s509_s0 = inlined_call_operand.hbm [shape: f32[8,256], index: 0, kind: input, shape index: {}]   ;;  %s510_s1 = inlined_call_operand.hbm [shape: bf16[256,128], index: 1, kind: input, shape index: {}]   ;;  %s511_s2 = inlined_call_operand.vmem [shape: f32[1,128], index: 2, kind: input, shape index: {}]   ;;  %s512_s3 = inlined_call_operand.hbm [shape: f32[8,128], index: 3, kind: output, shape index: {0}]   ;;  %s513_s4 = inlined_call_operand.hbm [shape: f32[1,1,128], index: 4, kind: output, shape index: {1}]   ;;  %s514_s5 = inlined_call_operand.hbm [shape: f32[1,1,128], index: 5, kind: output, shape index: {2}]  }
   0x1   :  { %12 = vsyncpa [#allocation6], 0 }
   0x2   :  { %13 = vsyncpa [#allocation4], 0 }
   0x3   :  { %14 = vsyncpa [#allocation9], 0  ;;  %s454_s18 = smov [#allocation2]   ;;  %s455_s20 = smov [#allocation5]  }
   0x4   :  { %s21_s19 = sshll.u32 %s454_s18, 4  ;;  %s30_s21 = sshll.u32 %s455_s20, 4  ;;  %s22_s19 = int_to_ptr.vmem [resolvable:$true] %s21_s19  ;;  %s31_s21 = int_to_ptr.vmem [resolvable:$true] %s30_s21 }
   0x5   :  { %s354_s22 = scalar_lea.vmem %s22_s19, 256  ;;  %p359_p1 = scmp.lt.s32.totalorder %s22_s19, %s22_s19 }
   0x6   :  { %p355_p0 = scmp.ne.s32.totalorder %s22_s19, %s354_s22  ;;  %p360_p2 = scmp.lt.s32.totalorder %s354_s22, %s354_s22 }
   0x8   :  { %p361_p3 = por %p360_p2, %p359_p1 }
   0xa   :  { %p362_p4 = pnand %p361_p3, %p355_p0 }
   0xc   :  { %365 = shalt.err (!%p362_p4)
}
   0xd   :  { %24 = dma.hbm_to_vmem [thread:$0]  %s509_s0, 256, %s22_s19, [#allocation3]  }
   0xe   :  { %s374_s25 = scalar_lea.vmem %s31_s21, 2048  ;;  %p379_p6 = scmp.lt.s32.totalorder %s31_s21, %s31_s21 }
   0xf   :  { %p375_p5 = scmp.ne.s32.totalorder %s31_s21, %s374_s25  ;;  %p380_p7 = scmp.lt.s32.totalorder %s374_s25, %s374_s25 }
  0x11   :  { %p381_p8 = por %p380_p7, %p379_p6 }
  0x13   :  { %p382_p9 = pnand %p381_p8, %p375_p5 }
  0x15   :  { %385 = shalt.err (!%p382_p9)
}
  0x16   :  { %s456_s26 = smov 64   ;;  %s457_s27 = smov 4  }
  0x17   :  { %36 = dma.hbm_to_vmem [thread:$0]  %s510_s1, 2048, %s31_s21, [#allocation6], %s456_s26, %s456_s26, %s457_s27  }
  0x18   :  { %446 = dma.done.wait [#allocation3], 256  }
  0x19   :  { %447 = vsyncadd [#allocation3], 4294967040 }
  0x1a   :  { %448 = dma.done.wait [#allocation6], 2048  }
  0x1b   :  { %449 = vsyncadd [#allocation6], 4294965248  ;;  %v330_v0 = vld [vmem:[#allocation5 + $0x78] sm:$0xff]   ;;  %v332_v2 = vld [vmem:[#allocation5 + $0x70] sm:$0xff]   ;;  %s458_s30 = smov [#allocation7]  }
  0x1c   :  { %v331_v1 = vld [vmem:[#allocation5 + $0x38] sm:$0xff]   ;;  %301 = vmatprep.subr.bf16.mxu0 %v330_v0  ;;  %v333_v3 = vld [vmem:[#allocation5 + $0x30] sm:$0xff]   ;;  %v334_v4 = vld [vmem:[#allocation5 + $0x68] sm:$0xff]   ;;  %s247_s6 = sshll.u32 %s458_s30, 4  ;;  %s248_s6 = int_to_ptr.vmem [resolvable:$true] %s247_s6 }
  0x1d   :  { %302 = vmatpush3.bf16.msra.mxu0 %v331_v1  ;;  %v335_v5 = vld [vmem:[#allocation5 + $0x28] sm:$0xff]   ;;  %v336_v6 = vld [vmem:[#allocation5 + $0x60] sm:$0xff]   ;;  %v338_v8 = vld [vmem:[#allocation5 + $0x58] sm:$0xff]   ;;  %s386_s7 = scalar_lea.vmem %s248_s6, 128  ;;  %p391_p11 = scmp.lt.s32.totalorder %s248_s6, %s248_s6 }
  0x1e   :  { %303 = vmatprep.subr.bf16.mxu0 %v332_v2  ;;  %v337_v7 = vld [vmem:[#allocation5 + $0x20] sm:$0xff]   ;;  %v339_v9 = vld [vmem:[#allocation5 + $0x18] sm:$0xff]   ;;  %v340_v10 = vld [vmem:[#allocation5 + $0x50] sm:$0xff]   ;;  %p387_p10 = scmp.ne.s32.totalorder %s248_s6, %s386_s7  ;;  %p392_p12 = scmp.lt.s32.totalorder %s386_s7, %s386_s7 }
  0x1f   :  { %v47_v11 = vld [vmem:[#allocation2 + $0x8] sm:$0xff]  ;;  %v341_v13 = vld [vmem:[#allocation5 + $0x10] sm:$0xff]   ;;  %v342_v14 = vld [vmem:[#allocation5 + $0x48] sm:$0xff]  }
  0x20   :  { %v49_v12 = vpack.c.bf16 %v47_v11, %v47_v11  ;;  %v343_v15 = vld [vmem:[#allocation5 + $0x8] sm:$0xff]   ;;  %v344_v16 = vld [vmem:[#allocation5 + $0x40] sm:$0xff]   ;;  %v46_v18 = vld [vmem:[#allocation2] sm:$0xff]  ;;  %p393_p13 = por %p392_p12, %p391_p11 }
  0x21   :  { %304 = vmatpush3.bf16.msra.mxu0 %v333_v3  ;;  %v345_v17 = vld [vmem:[#allocation5] sm:$0xff]   ;;  %v48_v19 = vpack.c.bf16 %v46_v18, %v46_v18  ;;  %v284_v21 = vld [vmem:[%s511_s2] ss:$0 sm:$0xff] }
  0x22   :  { %305 = vmatprep.subr.bf16.mxu0 %v334_v4  ;;  %217 = vmatprep.mubr.bf16.mxu0 %v49_v12  ;;  %p394_p0 = pnand %p393_p13, %p387_p10 }
  0x25   :  { %306 = vmatpush3.bf16.msra.mxu0 %v335_v5 }
  0x26   :  { %307 = vmatprep.subr.bf16.mxu0 %v336_v6 }
  0x29   :  { %308 = vmatpush3.bf16.msra.mxu0 %v337_v7 }
  0x2a   :  { %309 = vmatprep.subr.bf16.mxu0 %v338_v8 }
  0x2d   :  { %310 = vmatpush3.bf16.msra.mxu0 %v339_v9 }
  0x2e   :  { %311 = vmatprep.subr.bf16.mxu0 %v340_v10 }
  0x31   :  { %312 = vmatpush3.bf16.msra.mxu0 %v341_v13 }
  0x32   :  { %313 = vmatprep.subr.bf16.mxu0 %v342_v14 }
  0x35   :  { %314 = vmatpush3.bf16.msra.mxu0 %v343_v15 }
  0x36   :  { %315 = vmatprep.subr.bf16.mxu0 %v344_v16 }
  0x39   :  { %316 = vmatpush3.bf16.msra.mxu0 %v345_v17 }
  0x3c   :  { %218 = vmatmul.mubr.bf16.vlgmr.msra.gmra.mxu0 %v48_v19 }
  0xfc   :  { %v317_v20 = vpop.f32.mrf.mxu0 }
  0xfe   :  { %v318_v22 = vpop.f32.mrf.mxu0 }
  0xff   :  { %v319_v23 = vadd.f32 %v318_v22, %v317_v20 }
 0x100   :  { %v320_v24 = vpop.f32.mrf.mxu0 }
 0x101   :  { %v220_v25 = vadd.f32 %v319_v23, %v284_v21 }
 0x102   :  { %v321_v26 = vpop.f32.mrf.mxu0 }
 0x103   :  { %v233_v27 = vmul.f32 %v220_v25, %v220_v25  ;;  %225 = vst [vmem:[#allocation7] sm:$0xff] %v220_v25  ;;  %v226_v28 = vrot.slane %v220_v25, 4 }
 0x104   :  { %397 = shalt.err (!%p394_p0)
}
 0x105   :  { %250 = dma.vmem_to_hbm [thread:$0]  %s248_s6, 128, %s512_s3, [#allocation4]   ;;  %v227_v29 = vadd.f32 %v226_v28, %v220_v25  ;;  %v234_v30 = vrot.slane %v233_v27, 4 }
 0x106   :  { %s459_s9 = smov [#allocation8]   ;;  %s460_s11 = smov [#allocation10]  }
 0x107   :  { %v228_v31 = vrot.slane %v227_v29, 2  ;;  %v235_v32 = vadd.f32 %v234_v30, %v233_v27  ;;  %s257_s10 = sshll.u32 %s459_s9, 4  ;;  %s267_s12 = sshll.u32 %s460_s11, 4  ;;  %s258_s10 = int_to_ptr.vmem [resolvable:$true] %s257_s10  ;;  %s268_s12 = int_to_ptr.vmem [resolvable:$true] %s267_s12 }
 0x108   :  { %s406_s13 = scalar_lea.vmem %s258_s10, 16  ;;  %s410_s3 = scalar_lea.vmem %s258_s10, 32 }
 0x109   :  { %v229_v33 = vadd.f32 %v228_v31, %v227_v29  ;;  %v236_v34 = vrot.slane %v235_v32, 2  ;;  %p407_p1 = scmp.ne.s32.totalorder %s258_s10, %s406_s13  ;;  %p411_p2 = scmp.lt.s32.totalorder %s258_s10, %s258_s10 }
 0x10a   :  { %p412_p3 = scmp.lt.s32.totalorder %s410_s3, %s406_s13 }
 0x10b   :  { %v230_v35 = vrot.slane %v229_v33, 1  ;;  %v237_v36 = vadd.f32 %v236_v34, %v235_v32 }
 0x10c   :  { %p413_p4 = por %p412_p3, %p411_p2 }
 0x10d   :  { %v231_v37 = vadd.f32 %v230_v35, %v229_v33  ;;  %v238_v38 = vrot.slane %v237_v36, 1 }
 0x10e   :  { %p414_p5 = pnand %p413_p4, %p407_p1 }
 0x10f   :  { %232 = vst [vmem:[#allocation8] sm:$0x1] %v231_v37  ;;  %v239_v39 = vadd.f32 %v238_v38, %v237_v36 }
 0x110   :  { %417 = shalt.err (!%p414_p5)
}
 0x111   :  { %260 = dma.vmem_to_hbm [thread:$0]  %s258_s10, 16, %s513_s4, [#allocation9]   ;;  %240 = vst [vmem:[#allocation10] sm:$0x1] %v239_v39 }
 0x112   :  { %s426_s16 = scalar_lea.vmem %s268_s12, 16  ;;  %s430_s17 = scalar_lea.vmem %s268_s12, 32 }
 0x113   :  { %p427_p6 = scmp.ne.s32.totalorder %s268_s12, %s426_s16  ;;  %p431_p7 = scmp.lt.s32.totalorder %s268_s12, %s268_s12 }
 0x114   :  { %p432_p8 = scmp.lt.s32.totalorder %s430_s17, %s426_s16 }
 0x116   :  { %p433_p9 = por %p432_p8, %p431_p7 }
 0x118   :  { %p434_p10 = pnand %p433_p9, %p427_p6 }
 0x11a   :  { %437 = shalt.err (!%p434_p10)
}
 0x11b   :  { %270 = dma.vmem_to_hbm [thread:$0]  %s268_s12, 16, %s514_s5, [#allocation9]  }
 0x11c   :  { %450 = dma.done.wait [#allocation4], 128  }
 0x11d   :  { %451 = vsyncadd [#allocation4], 4294967168 }
 0x11e   :  { %452 = dma.done.wait [#allocation9], 32  }
 0x11f   :  { %453 = vsyncadd [#allocation9], 4294967264 }
 0x120   :  { %280 = vsyncpa [#allocation3], 1 }
 0x121   :  { %281 = vsyncpa [#allocation6], 1 }
 0x122   :  { %282 = vsyncpa [#allocation4], 1 }
 0x123   :  { %283 = vsyncpa [#allocation9], 1 }

</bundles_post_ra>
